<compile_context>
chip_gen: v5e
topology: v5e:2x2
jax: 0.10.0
libtpu: 0.0.40
codegen_flags: <defaults>
</compile_context>

<pallas_src>
import math
import functools

import jax
import jax.numpy as jnp
from jax.experimental import pallas as pl
from jax.experimental.pallas import tpu as pltpu


def _round_up(v, m):
    return ((v + m - 1) // m) * m


def _aspp_conv_kernel(x_ref, w_ref, b_ref, o_ref, acc_ref, *, offsets, s_tile):
    """One (batch, cin-chunk) grid step.

    x_ref  : (tileC, S_x)              padded activations, flat (h*Wp + w) on lanes
    w_ref  : (KH*KW, Cout_pad, tileC)  BN-folded conv weights for this Cin chunk
    b_ref  : (Cout_pad, 1)             folded BN bias (f32)
    o_ref  : (Cout_pad, S_tile)        lane-dense output slab (f32)
    acc_ref: (Cout_pad, S_tile)        f32 accumulator across Cin chunks
    """
    c = pl.program_id(1)

    @pl.when(c == 0)
    def _init():
        acc_ref[...] = jnp.zeros_like(acc_ref)

    # NOTE: at toy widths (Cout=8, Cin=4) the MXU is <2% utilized and the binding
    # resource is HBM/DMA traffic, so no matmul-shape tuning is attempted here.
    acc = acc_ref[...]
    for k, off in enumerate(offsets):            # static unroll over the KH*KW taps
        xk = x_ref[:, off:off + s_tile]          # static lane-offset slice (pure VMEM)
        acc = acc + jnp.dot(w_ref[k], xk, preferred_element_type=jnp.float32)
    acc_ref[...] = acc

    @pl.when(c == pl.num_programs(1) - 1)
    def _finalize():
        o_ref[...] = jnp.maximum(acc_ref[...] + b_ref[...], 0.0).astype(o_ref.dtype)


def _vmem_limit_bytes():
    """Generation-aware VMEM limit: ~3/4 of per-core VMEM, capped at 96 MiB
    (128-MiB v5e/v6e) and ~48 MiB on v7x (64 MiB per TensorCore)."""
    try:
        cap = int(pltpu.get_tpu_info().vmem_capacity_bytes)
    except Exception:
        cap = 64 << 20
    return int(min(cap * 3 // 4, 96 << 20))


def _pick_cin_tile(cin_aligned, cout_pad, s_x, s_tile, khkw, in_bytes, c_align, budget):
    """Largest Cin chunk (multiple of c_align) whose *double-buffered* input/output
    blocks plus the f32 scratch accumulator fit the per-step VMEM budget."""
    fixed = (2 * cout_pad * 1 * 4            # bias block (double-buffered)
             + 2 * cout_pad * s_tile * 4     # output block (double-buffered)
             + cout_pad * s_tile * 4)        # f32 scratch accumulator
    best = c_align
    tc = c_align
    while tc <= cin_aligned:
        need = fixed + 2 * tc * s_x * in_bytes + 2 * khkw * cout_pad * tc * in_bytes
        if need <= budget:
            best = tc
        tc += c_align
    return best


def aspp_module_forward(x_nchw, weight_oihw, gamma, beta, running_mean,
                        running_var, *, padding, dilation, eps=1e-5,
                        compute_dtype=jnp.bfloat16):
    """Forward of _ASPPModule: dilated conv (no bias) -> BatchNorm2d (eval) -> ReLU.

    x_nchw      : (N, Cin, H, W)   NCHW, like PyTorch
    weight_oihw : (Cout, Cin, KH, KW)
    returns     : (N, Cout, H_out, W_out) float32, NCHW
    """
    # TODO(synk): only eval-mode (running-stats) BatchNorm is folded; training-mode
    # batch statistics are not supported.
    N, Cin, H, W = x_nchw.shape
    Cout, _, KH, KW = weight_oihw.shape

    # ---- geometry ----
    Hp, Wp = H + 2 * padding, W + 2 * padding
    H_out = Hp - dilation * (KH - 1)
    W_out = Wp - dilation * (KW - 1)
    assert H_out > 0 and W_out > 0

    # "Wide" GEMM spatial axis: every output row keeps Wp columns; columns with
    # w >= W_out are junk and sliced off afterwards.  This makes each (kh, kw) tap a
    # single contiguous lane-offset slice of the flattened padded input.
    khkw = KH * KW
    offsets = [kh * dilation * Wp + kw * dilation
               for kh in range(KH) for kw in range(KW)]
    S_wide = H_out * Wp
    S_tile = _round_up(S_wide, 128)                  # lane-dense output width
    S_x = _round_up(max(offsets) + S_tile, 128)      # input slab width (covers all slices)

    in_bytes = jnp.dtype(compute_dtype).itemsize
    c_align = 16 if in_bytes < 4 else 8              # sublane packing alignment
    cout_pad = _round_up(Cout, 8)
    cin_aligned = _round_up(Cin, c_align)

    vmem_limit = _vmem_limit_bytes()
    tile_c = _pick_cin_tile(cin_aligned, cout_pad, S_x, S_tile, khkw,
                            in_bytes, c_align, budget=vmem_limit // 2)
    # TODO(synk): if even a single c_align-wide Cin chunk exceeds the budget (very
    # large H*W), a haloed-row manual-DMA spatial tiling (memory_space=pl.ANY +
    # make_async_copy) is required; not needed at ASPP feature-map sizes.
    n_chunks = -(-cin_aligned // tile_c)
    cin_pad = n_chunks * tile_c

    # ---- wrapper-side glue (XLA): pad, flatten, fold BN into the weights ----
    x_pad = jnp.pad(x_nchw, ((0, 0), (0, 0), (padding, padding), (padding, padding)))
    x_flat = x_pad.reshape(N, Cin, Hp * Wp)
    x_flat = jnp.pad(x_flat, ((0, 0), (0, cin_pad - Cin), (0, S_x - Hp * Wp)))
    x_flat = x_flat.astype(compute_dtype)

    scale = gamma / jnp.sqrt(running_var + eps)                      # (Cout,)
    bias = beta - running_mean * scale                               # (Cout,)
    # w_fold[k, o, c] = weight[o, c, kh, kw] * scale[o],  k = kh*KW + kw
    w_fold = jnp.transpose(weight_oihw, (2, 3, 0, 1)).reshape(khkw, Cout, Cin)
    w_fold = w_fold * scale[None, :, None]
    w_fold = jnp.pad(w_fold, ((0, 0), (0, cout_pad - Cout), (0, cin_pad - Cin)))
    w_fold = w_fold.astype(compute_dtype)
    # (n_chunks, KH*KW, Cout_pad, tile_c): the Cin-chunk selection lives on a leading
    # axis so the weight block's last two dims are always full/aligned.
    w_fold = w_fold.reshape(khkw, cout_pad, n_chunks, tile_c).transpose(2, 0, 1, 3)
    bias_col = jnp.pad(bias, (0, cout_pad - Cout)).reshape(cout_pad, 1).astype(jnp.float32)

    # Batch is "parallel" (N>=2 keeps both v7x TensorCores busy); Cin chunks reduce.
    grid = (N, n_chunks)

    out = pl.pallas_call(
        functools.partial(_aspp_conv_kernel, offsets=tuple(offsets), s_tile=S_tile),
        out_shape=jax.ShapeDtypeStruct((N, cout_pad, S_tile), jnp.float32),
        grid_spec=pltpu.PrefetchScalarGridSpec(
            num_scalar_prefetch=0,
            grid=grid,
            in_specs=[
                pl.BlockSpec((None, tile_c, S_x), lambda n, c: (n, c, 0)),
                pl.BlockSpec((None, khkw, cout_pad, tile_c), lambda n, c: (c, 0, 0, 0)),
                pl.BlockSpec((cout_pad, 1), lambda n, c: (0, 0)),
            ],
            out_specs=pl.BlockSpec((None, cout_pad, S_tile), lambda n, c: (n, 0, 0)),
            scratch_shapes=[pltpu.VMEM((cout_pad, S_tile), jnp.float32)],
        ),
        compiler_params=pltpu.CompilerParams(
            dimension_semantics=("parallel", "arbitrary"),
            vmem_limit_bytes=vmem_limit),
    )(x_flat, w_fold, bias_col)

    # Drop channel padding and junk columns: (N, Cout, H_out, Wp) -> keep w < W_out.
    out = out[:, :Cout, :S_wide].reshape(N, Cout, H_out, Wp)[:, :, :, :W_out]
    return out


def _reference_forward(x, weight, gamma, beta, mean, var, *, padding, dilation,
                       eps=1e-5, quantize_dtype=None):
    """Pure-JAX/XLA reference.  If quantize_dtype is set, activations and folded
    weights are rounded through that dtype first (mirrors the kernel's bf16 fast
    path) but the conv math stays f32."""
    scale = gamma / jnp.sqrt(var + eps)
    w = weight * scale[:, None, None, None]
    if quantize_dtype is not None:
        x = x.astype(quantize_dtype).astype(jnp.float32)
        w = w.astype(quantize_dtype).astype(jnp.float32)
    y = jax.lax.conv_general_dilated(
        x, w, window_strides=(1, 1),
        padding=((padding, padding), (padding, padding)),
        rhs_dilation=(dilation, dilation),
        dimension_numbers=("NCHW", "OIHW", "NCHW"),
        precision=jax.lax.Precision.HIGHEST)
    bias = (beta - mean * scale).reshape(1, -1, 1, 1)
    return jnp.maximum(y + bias, 0.0)


if __name__ == "__main__":
    # Module config: _ASPPModule(inplanes=4, planes=8, kernel_size=3, padding=2, dilation=2)
    inplanes, planes, kernel_size, padding, dilation = 4, 8, 3, 2, 2
    N, H, W = 2, 16, 16

    key = jax.random.PRNGKey(0)
    kx, kw, km, kv = jax.random.split(key, 4)

    x = jax.random.normal(kx, (N, inplanes, H, W), dtype=jnp.float32)

    # kaiming_normal_ on the conv weight (fan_in = Cin*KH*KW, gain = sqrt(2))
    fan_in = inplanes * kernel_size * kernel_size
    std = math.sqrt(2.0 / fan_in)
    weight = std * jax.random.normal(
        kw, (planes, inplanes, kernel_size, kernel_size), dtype=jnp.float32)

    # BatchNorm2d params: weight=1, bias=0 (as in _init_weight); eval-mode running
    # stats, initialized deterministically (running_var > 0).
    gamma = jnp.ones((planes,), jnp.float32)
    beta = jnp.zeros((planes,), jnp.float32)
    running_mean = 0.1 * jax.random.normal(km, (planes,), dtype=jnp.float32)
    running_var = 1.0 + 0.1 * jax.random.uniform(kv, (planes,), dtype=jnp.float32)

    out = aspp_module_forward(x, weight, gamma, beta, running_mean, running_var,
                              padding=padding, dilation=dilation)
    out = jax.block_until_ready(out)
    assert out.shape == (N, planes, H, W), out.shape

    # Strict check vs. a reference fed the same bf16-rounded inputs (the kernel
    # accumulates in f32, so only summation order differs).
    ref_q = _reference_forward(x, weight, gamma, beta, running_mean, running_var,
                               padding=padding, dilation=dilation,
                               quantize_dtype=jnp.bfloat16)
    assert jnp.allclose(out, ref_q, atol=1e-3, rtol=1e-3), \
        float(jnp.max(jnp.abs(out - ref_q)))

    # Loose sanity check vs. the full-f32 reference (difference = bf16 input rounding).
    ref_f32 = _reference_forward(x, weight, gamma, beta, running_mean, running_var,
                                 padding=padding, dilation=dilation)
    assert jnp.allclose(out, ref_f32, atol=5e-2, rtol=5e-2), \
        float(jnp.max(jnp.abs(out - ref_f32)))

    print("KERNEL_OK")
</pallas_src>

<mosaic_0001>
module attributes {stable_mosaic.version = 11 : i64} {
  func.func @_aspp_conv_kernel(%arg0: i32, %arg1: i32, %arg2: memref<1x16x512xbf16, #tpu.memory_space<vmem>>, %arg3: memref<1x9x8x16xbf16, #tpu.memory_space<vmem>>, %arg4: memref<8x1xf32, #tpu.memory_space<vmem>>, %arg5: memref<1x8x384xf32, #tpu.memory_space<vmem>>, %arg6: memref<8x384xf32, #tpu.memory_space<vmem>>) attributes {dimension_semantics = [#tpu.dimension_semantics<parallel>, #tpu.dimension_semantics<arbitrary>], iteration_bounds = array<i64: 2, 1>, scalar_prefetch = 0 : i64, scratch_operands = 1 : i64, tpu.core_type = #tpu.core_type<tc>, window_params = [{transform_indices = @transform_0, window_bounds = array<i64: 1, 16, 512>}, {transform_indices = @transform_1, window_bounds = array<i64: 1, 9, 8, 16>}, {pipeline_mode = #tpu.pipeline_mode<synchronous>, transform_indices = @transform_2, window_bounds = array<i64: 8, 1>}, {transform_indices = @transform_3, window_bounds = array<i64: 1, 8, 384>}]} {
    %c0_i32 = arith.constant 0 : i32
    %0 = arith.cmpi eq, %arg1, %c0_i32 : i32
    %1 = arith.extui %0 : i1 to i32
    %c0_i32_0 = arith.constant 0 : i32
    %2 = arith.cmpi ne, %1, %c0_i32_0 : i32
    scf.if %2 {
      %cst_63 = arith.constant 0.000000e+00 : f32
      %62 = vector.broadcast %cst_63 : f32 to vector<8x384xf32>
      %c0_64 = arith.constant 0 : index
      %c0_65 = arith.constant 0 : index
      %63 = vector.load %arg6[%c0_64, %c0_65] : memref<8x384xf32, #tpu.memory_space<vmem>>, vector<8x384xf32>
      tpu.vector_store %arg6[%c0_64, %c0_65], %62 {strides = array<i32>} : memref<8x384xf32, #tpu.memory_space<vmem>>, vector<8x384xf32>,
    } else {
    }
    %c0 = arith.constant 0 : index
    %c0_1 = arith.constant 0 : index
    %3 = vector.load %arg6[%c0, %c0_1] : memref<8x384xf32, #tpu.memory_space<vmem>>, vector<8x384xf32>
    %c0_2 = arith.constant 0 : index
    %c0_3 = arith.constant 0 : index
    %c0_4 = arith.constant 0 : index
    %4 = vector.load %arg2[%c0_2, %c0_3, %c0_4] : memref<1x16x512xbf16, #tpu.memory_space<vmem>>, vector<1x16x384xbf16>
    %5 = vector.shape_cast %4 : vector<1x16x384xbf16> to vector<16x384xbf16>
    %c0_5 = arith.constant 0 : index
    %c0_6 = arith.constant 0 : index
    %c0_7 = arith.constant 0 : index
    %c0_8 = arith.constant 0 : index
    %6 = vector.load %arg3[%c0_5, %c0_6, %c0_7, %c0_8] : memref<1x9x8x16xbf16, #tpu.memory_space<vmem>>, vector<1x1x8x16xbf16>
    %7 = vector.shape_cast %6 : vector<1x1x8x16xbf16> to vector<8x16xbf16>
    %cst = arith.constant dense<0.000000e+00> : vector<8x384xf32>
    %8 = tpu.matmul %7, %5, %cst {dimension_numbers = #tpu.dot_dimension_numbers<[1], [0], [0], [1], [0, 0, 1, 1], [], []>} : vector<8x16xbf16>, vector<16x384xbf16>, vector<8x384xf32> -> vector<8x384xf32>
    %9 = arith.addf %3, %8 : vector<8x384xf32>
    %c0_9 = arith.constant 0 : index
    %c0_10 = arith.constant 0 : index
    %c2 = arith.constant 2 : index
    %10 = vector.load %arg2[%c0_9, %c0_10, %c2] : memref<1x16x512xbf16, #tpu.memory_space<vmem>>, vector<1x16x384xbf16>
    %11 = vector.shape_cast %10 : vector<1x16x384xbf16> to vector<16x384xbf16>
    %c0_11 = arith.constant 0 : index
    %c1 = arith.constant 1 : index
    %c0_12 = arith.constant 0 : index
    %c0_13 = arith.constant 0 : index
    %12 = vector.load %arg3[%c0_11, %c1, %c0_12, %c0_13] : memref<1x9x8x16xbf16, #tpu.memory_space<vmem>>, vector<1x1x8x16xbf16>
    %13 = vector.shape_cast %12 : vector<1x1x8x16xbf16> to vector<8x16xbf16>
    %cst_14 = arith.constant dense<0.000000e+00> : vector<8x384xf32>
    %14 = tpu.matmul %13, %11, %cst_14 {dimension_numbers = #tpu.dot_dimension_numbers<[1], [0], [0], [1], [0, 0, 1, 1], [], []>} : vector<8x16xbf16>, vector<16x384xbf16>, vector<8x384xf32> -> vector<8x384xf32>
    %15 = arith.addf %9, %14 : vector<8x384xf32>
    %c0_15 = arith.constant 0 : index
    %c0_16 = arith.constant 0 : index
    %c4 = arith.constant 4 : index
    %16 = vector.load %arg2[%c0_15, %c0_16, %c4] : memref<1x16x512xbf16, #tpu.memory_space<vmem>>, vector<1x16x384xbf16>
    %17 = vector.shape_cast %16 : vector<1x16x384xbf16> to vector<16x384xbf16>
    %c0_17 = arith.constant 0 : index
    %c2_18 = arith.constant 2 : index
    %c0_19 = arith.constant 0 : index
    %c0_20 = arith.constant 0 : index
    %18 = vector.load %arg3[%c0_17, %c2_18, %c0_19, %c0_20] : memref<1x9x8x16xbf16, #tpu.memory_space<vmem>>, vector<1x1x8x16xbf16>
    %19 = vector.shape_cast %18 : vector<1x1x8x16xbf16> to vector<8x16xbf16>
    %cst_21 = arith.constant dense<0.000000e+00> : vector<8x384xf32>
    %20 = tpu.matmul %19, %17, %cst_21 {dimension_numbers = #tpu.dot_dimension_numbers<[1], [0], [0], [1], [0, 0, 1, 1], [], []>} : vector<8x16xbf16>, vector<16x384xbf16>, vector<8x384xf32> -> vector<8x384xf32>
    %21 = arith.addf %15, %20 : vector<8x384xf32>
    %c0_22 = arith.constant 0 : index
    %c0_23 = arith.constant 0 : index
    %c40 = arith.constant 40 : index
    %22 = vector.load %arg2[%c0_22, %c0_23, %c40] : memref<1x16x512xbf16, #tpu.memory_space<vmem>>, vector<1x16x384xbf16>
    %23 = vector.shape_cast %22 : vector<1x16x384xbf16> to vector<16x384xbf16>
    %c0_24 = arith.constant 0 : index
    %c3 = arith.constant 3 : index
    %c0_25 = arith.constant 0 : index
    %c0_26 = arith.constant 0 : index
    %24 = vector.load %arg3[%c0_24, %c3, %c0_25, %c0_26] : memref<1x9x8x16xbf16, #tpu.memory_space<vmem>>, vector<1x1x8x16xbf16>
    %25 = vector.shape_cast %24 : vector<1x1x8x16xbf16> to vector<8x16xbf16>
    %cst_27 = arith.constant dense<0.000000e+00> : vector<8x384xf32>
    %26 = tpu.matmul %25, %23, %cst_27 {dimension_numbers = #tpu.dot_dimension_numbers<[1], [0], [0], [1], [0, 0, 1, 1], [], []>} : vector<8x16xbf16>, vector<16x384xbf16>, vector<8x384xf32> -> vector<8x384xf32>
    %27 = arith.addf %21, %26 : vector<8x384xf32>
    %c0_28 = arith.constant 0 : index
    %c0_29 = arith.constant 0 : index
    %c42 = arith.constant 42 : index
    %28 = vector.load %arg2[%c0_28, %c0_29, %c42] : memref<1x16x512xbf16, #tpu.memory_space<vmem>>, vector<1x16x384xbf16>
    %29 = vector.shape_cast %28 : vector<1x16x384xbf16> to vector<16x384xbf16>
    %c0_30 = arith.constant 0 : index
    %c4_31 = arith.constant 4 : index
    %c0_32 = arith.constant 0 : index
    %c0_33 = arith.constant 0 : index
    %30 = vector.load %arg3[%c0_30, %c4_31, %c0_32, %c0_33] : memref<1x9x8x16xbf16, #tpu.memory_space<vmem>>, vector<1x1x8x16xbf16>
    %31 = vector.shape_cast %30 : vector<1x1x8x16xbf16> to vector<8x16xbf16>
    %cst_34 = arith.constant dense<0.000000e+00> : vector<8x384xf32>
    %32 = tpu.matmul %31, %29, %cst_34 {dimension_numbers = #tpu.dot_dimension_numbers<[1], [0], [0], [1], [0, 0, 1, 1], [], []>} : vector<8x16xbf16>, vector<16x384xbf16>, vector<8x384xf32> -> vector<8x384xf32>
    %33 = arith.addf %27, %32 : vector<8x384xf32>
    %c0_35 = arith.constant 0 : index
    %c0_36 = arith.constant 0 : index
    %c44 = arith.constant 44 : index
    %34 = vector.load %arg2[%c0_35, %c0_36, %c44] : memref<1x16x512xbf16, #tpu.memory_space<vmem>>, vector<1x16x384xbf16>
    %35 = vector.shape_cast %34 : vector<1x16x384xbf16> to vector<16x384xbf16>
    %c0_37 = arith.constant 0 : index
    %c5 = arith.constant 5 : index
    %c0_38 = arith.constant 0 : index
    %c0_39 = arith.constant 0 : index
    %36 = vector.load %arg3[%c0_37, %c5, %c0_38, %c0_39] : memref<1x9x8x16xbf16, #tpu.memory_space<vmem>>, vector<1x1x8x16xbf16>
    %37 = vector.shape_cast %36 : vector<1x1x8x16xbf16> to vector<8x16xbf16>
    %cst_40 = arith.constant dense<0.000000e+00> : vector<8x384xf32>
    %38 = tpu.matmul %37, %35, %cst_40 {dimension_numbers = #tpu.dot_dimension_numbers<[1], [0], [0], [1], [0, 0, 1, 1], [], []>} : vector<8x16xbf16>, vector<16x384xbf16>, vector<8x384xf32> -> vector<8x384xf32>
    %39 = arith.addf %33, %38 : vector<8x384xf32>
    %c0_41 = arith.constant 0 : index
    %c0_42 = arith.constant 0 : index
    %c80 = arith.constant 80 : index
    %40 = vector.load %arg2[%c0_41, %c0_42, %c80] : memref<1x16x512xbf16, #tpu.memory_space<vmem>>, vector<1x16x384xbf16>
    %41 = vector.shape_cast %40 : vector<1x16x384xbf16> to vector<16x384xbf16>
    %c0_43 = arith.constant 0 : index
    %c6 = arith.constant 6 : index
    %c0_44 = arith.constant 0 : index
    %c0_45 = arith.constant 0 : index
    %42 = vector.load %arg3[%c0_43, %c6, %c0_44, %c0_45] : memref<1x9x8x16xbf16, #tpu.memory_space<vmem>>, vector<1x1x8x16xbf16>
    %43 = vector.shape_cast %42 : vector<1x1x8x16xbf16> to vector<8x16xbf16>
    %cst_46 = arith.constant dense<0.000000e+00> : vector<8x384xf32>
    %44 = tpu.matmul %43, %41, %cst_46 {dimension_numbers = #tpu.dot_dimension_numbers<[1], [0], [0], [1], [0, 0, 1, 1], [], []>} : vector<8x16xbf16>, vector<16x384xbf16>, vector<8x384xf32> -> vector<8x384xf32>
    %45 = arith.addf %39, %44 : vector<8x384xf32>
    %c0_47 = arith.constant 0 : index
    %c0_48 = arith.constant 0 : index
    %c82 = arith.constant 82 : index
    %46 = vector.load %arg2[%c0_47, %c0_48, %c82] : memref<1x16x512xbf16, #tpu.memory_space<vmem>>, vector<1x16x384xbf16>
    %47 = vector.shape_cast %46 : vector<1x16x384xbf16> to vector<16x384xbf16>
    %c0_49 = arith.constant 0 : index
    %c7 = arith.constant 7 : index
    %c0_50 = arith.constant 0 : index
    %c0_51 = arith.constant 0 : index
    %48 = vector.load %arg3[%c0_49, %c7, %c0_50, %c0_51] : memref<1x9x8x16xbf16, #tpu.memory_space<vmem>>, vector<1x1x8x16xbf16>
    %49 = vector.shape_cast %48 : vector<1x1x8x16xbf16> to vector<8x16xbf16>
    %cst_52 = arith.constant dense<0.000000e+00> : vector<8x384xf32>
    %50 = tpu.matmul %49, %47, %cst_52 {dimension_numbers = #tpu.dot_dimension_numbers<[1], [0], [0], [1], [0, 0, 1, 1], [], []>} : vector<8x16xbf16>, vector<16x384xbf16>, vector<8x384xf32> -> vector<8x384xf32>
    %51 = arith.addf %45, %50 : vector<8x384xf32>
    %c0_53 = arith.constant 0 : index
    %c0_54 = arith.constant 0 : index
    %c84 = arith.constant 84 : index
    %52 = vector.load %arg2[%c0_53, %c0_54, %c84] : memref<1x16x512xbf16, #tpu.memory_space<vmem>>, vector<1x16x384xbf16>
    %53 = vector.shape_cast %52 : vector<1x16x384xbf16> to vector<16x384xbf16>
    %c0_55 = arith.constant 0 : index
    %c8 = arith.constant 8 : index
    %c0_56 = arith.constant 0 : index
    %c0_57 = arith.constant 0 : index
    %54 = vector.load %arg3[%c0_55, %c8, %c0_56, %c0_57] : memref<1x9x8x16xbf16, #tpu.memory_space<vmem>>, vector<1x1x8x16xbf16>
    %55 = vector.shape_cast %54 : vector<1x1x8x16xbf16> to vector<8x16xbf16>
    %cst_58 = arith.constant dense<0.000000e+00> : vector<8x384xf32>
    %56 = tpu.matmul %55, %53, %cst_58 {dimension_numbers = #tpu.dot_dimension_numbers<[1], [0], [0], [1], [0, 0, 1, 1], [], []>} : vector<8x16xbf16>, vector<16x384xbf16>, vector<8x384xf32> -> vector<8x384xf32>
    %57 = arith.addf %51, %56 : vector<8x384xf32>
    %c0_59 = arith.constant 0 : index
    %c0_60 = arith.constant 0 : index
    %58 = vector.load %arg6[%c0_59, %c0_60] : memref<8x384xf32, #tpu.memory_space<vmem>>, vector<8x384xf32>
    tpu.vector_store %arg6[%c0_59, %c0_60], %57 {strides = array<i32>} : memref<8x384xf32, #tpu.memory_space<vmem>>, vector<8x384xf32>,
    %c0_i32_61 = arith.constant 0 : i32
    %59 = arith.cmpi eq, %arg1, %c0_i32_61 : i32
    %60 = arith.extui %59 : i1 to i32
    %c0_i32_62 = arith.constant 0 : i32
    %61 = arith.cmpi ne, %60, %c0_i32_62 : i32
    scf.if %61 {
      %c0_63 = arith.constant 0 : index
      %c0_64 = arith.constant 0 : index
      %62 = vector.load %arg6[%c0_63, %c0_64] : memref<8x384xf32, #tpu.memory_space<vmem>>, vector<8x384xf32>
      %c0_65 = arith.constant 0 : index
      %c0_66 = arith.constant 0 : index
      %63 = vector.load %arg4[%c0_65, %c0_66] : memref<8x1xf32, #tpu.memory_space<vmem>>, vector<8x1xf32>
      %64 = vector.broadcast %63 : vector<8x1xf32> to vector<8x384xf32>
      %65 = arith.addf %62, %64 : vector<8x384xf32>
      %cst_67 = arith.constant 0.000000e+00 : f32
      %66 = vector.broadcast %cst_67 : f32 to vector<8x384xf32>
      %67 = arith.maximumf %65, %66 : vector<8x384xf32>
      %c0_68 = arith.constant 0 : index
      %c0_69 = arith.constant 0 : index
      %c0_70 = arith.constant 0 : index
      %68 = vector.load %arg5[%c0_68, %c0_69, %c0_70] : memref<1x8x384xf32, #tpu.memory_space<vmem>>, vector<1x8x384xf32>
      %69 = vector.shape_cast %68 : vector<1x8x384xf32> to vector<8x384xf32>
      %70 = vector.shape_cast %67 : vector<8x384xf32> to vector<1x8x384xf32>
      tpu.vector_store %arg5[%c0_68, %c0_69, %c0_70], %70 {strides = array<i32>} : memref<1x8x384xf32, #tpu.memory_space<vmem>>, vector<1x8x384xf32>,
    } else {
    }
    return
  }
  func.func @transform_0(%arg0: i32, %arg1: i32) -> (i32, i32, i32) {
    %c0_i32 = arith.constant 0 : i32
    %c0_i32_0 = arith.constant 0 : i32
    return %arg0, %arg1, %c0_i32 : i32, i32, i32
  }
  func.func @transform_1(%arg0: i32, %arg1: i32) -> (i32, i32, i32, i32) {
    %c0_i32 = arith.constant 0 : i32
    %c0_i32_0 = arith.constant 0 : i32
    %c0_i32_1 = arith.constant 0 : i32
    %c0_i32_2 = arith.constant 0 : i32
    return %arg1, %c0_i32, %c0_i32_0, %c0_i32_1 : i32, i32, i32, i32
  }
  func.func @transform_2(%arg0: i32, %arg1: i32) -> (i32, i32) {
    %c0_i32 = arith.constant 0 : i32
    %c0_i32_0 = arith.constant 0 : i32
    %c0_i32_1 = arith.constant 0 : i32
    return %c0_i32, %c0_i32_0 : i32, i32
  }
  func.func @transform_3(%arg0: i32, %arg1: i32) -> (i32, i32, i32) {
    %c0_i32 = arith.constant 0 : i32
    %c0_i32_0 = arith.constant 0 : i32
    %c0_i32_1 = arith.constant 0 : i32
    return %arg0, %c0_i32, %c0_i32_0 : i32, i32, i32
  }
}

</mosaic_0001>

<bundles_post_ra>
// kernel: tpu_custom_call.1
= control target key start
LH: loop header
LB: loop body
LE: loop exit
PB: predicated region body
PF: predicated region fallthrough
CT: control target
= control target key end

     0   :  { %s1538_s0 = inlined_call_operand.hbm [shape: bf16[2,16,512], index: 0, kind: input, shape index: {}]   ;;  %s1539_s1 = inlined_call_operand.hbm [shape: bf16[1,9,8,16], index: 1, kind: input, shape index: {}]   ;;  %s1540_s2 = inlined_call_operand.vmem [shape: f32[8,1], index: 2, kind: input, shape index: {}]   ;;  %s1541_s3 = inlined_call_operand.hbm [shape: f32[2,8,384], index: 3, kind: output, shape index: {}]  }
   0x1   :  { %1542 = sst [smem:[#allocation12_spill]] %s1539_s1 }
   0x2   :  { %8 = vsyncpa [#allocation4], 0 }
   0x3   :  { %10 = vsyncpa [#allocation4 + $0x1], 0 }
   0x4   :  { %11 = vsyncpa [#allocation7], 0 }
   0x5   :  { %12 = vsyncpa [#allocation5], 0 }
   0x6   :  { %14 = vsyncpa [#allocation5 + $0x1], 0  ;;  %s1311_s12 = smov 0   ;;  %s1313_s13 = smov 0  }
   0x7   :  { %s1315_s14 = smov 0   ;;  %s1317_s15 = smov 0  }
   0x8   :  { %s1319_s16 = smov 0   ;;  %s1321_s17 = smov 0  }
   0x9 LB: > { %s962_s18 = sadd.s32 4294967295, %s1275_s17   ;;  %s963_s19 = sadd.s32 4294967294, %s1275_s17   ;;  %s1275_s17 = sphi %s1321_s17, %s20_s17   ;;  %s1271_s16 = sphi %s1319_s16, %s1555_s16   ;;  %s1267_s15 = sphi %s1317_s15, %s1554_s15   ;;  %s1263_s14 = sphi %s1315_s14, %s1553_s14   ;;  %s1259_s13 = sphi %s1313_s13, %s1552_s13   ;;  %s1255_s12 = sphi %s1311_s12, %s1551_s12  }
   0xa   : > { %p54_p0 = scmp.ne.s32.totalorder %s1259_s13, %s1255_s12  ;;  %p1345_p1 = scmp.eq.s32.totalorder %s962_s18, 0 }
   0xb   : > { %p1349_p2 = scmp.eq.s32.totalorder %s962_s18, 1  ;;  %p131_p3 = scmp.eq.s32.totalorder %s963_s19, 1 }
   0xc   : > { %p1355_p4 = por %p1345_p1, %p54_p0  ;;  %p964_p5 = scmp.ge.s32.totalorder %s1275_s17, 1 }
   0xd   : > { %p1360_p6 = por %p131_p3, %p54_p0  ;;  %p138_p7 = scmp.lt.s32.totalorder %s1275_s17, 3 }
   0xe   : > { %s1547_s1 = sld [smem:[#allocation12_spill]]  ;;  %s1277_s28 = smov [#allocation6]  }
   0xf   : > { %p1368_p8 = pnand %p964_p5, %p138_p7  ;;  %s154_s29 = sshll.u32 %s1277_s28, 4  ;;  %s155_s29 = int_to_ptr.vmem [resolvable:$true] %s154_s29 }
  0x10   : > { %p966_p11 = scmp.ge.s32.totalorder %s1275_s17, 2  ;;  %s1278_s30 = smov 64  }
  0x11   : > { %p1049_p9 = pneg %p1368_p8  ;;  %s1279_s4 = smov 4  }
  0x12   : > { %s32_s5 = sadd.s32 1, %s1271_s16  ;;  %s41_s6 = sadd.s32 1, %s1263_s14 }
  0x13   : > { %p1050_p10 = pnand %p1049_p9, %p1345_p1  ;;  %p34_p12 = scmp.ge.s32.totalorder %s32_s5, 2 }
  0x14   : > { %s152_s26 = sshll.u32 %s1547_s1, 4  ;;  %p48_p13 = scmp.ne.s32.totalorder %s1263_s14, %s1259_s13  ;;  %s153_s26 = int_to_ptr.hbm [resolvable:$true] %s152_s26 }
  0x15   : > { %1052 = dma.hbm_to_vmem [thread:$0]  (!%p1050_p10), %s153_s26, 576, %s155_s29, [#allocation7], %s1278_s30, %s1278_s30, %s1279_s4  }
  0x16   : > { %p49_p0 = scmp.eq.s32.totalorder %s1275_s17, 0  ;;  %s1557_s5 = smov (%p34_p12, %s32_s5), 0 }
  0x17   : > { %p1390_p5 = por %p1349_p2, %p48_p13  ;;  %s36_s9 = ssub.s32 %s1271_s16, %s1557_s5 }
  0x18   : > { %p1384_p3 = por %p49_p0, %p48_p13  ;;  %p1062_p7 = scmp.lt.s32.totalorder %s1275_s17, 2 }
  0x19   : > { %p39_p9 = scmp.eq.s32.totalorder %s36_s9, 0  ;;  %s171_s10 = sand.u32 1, %s1263_s14  }
  0x1a   : > { %s967_s11 = sshll.u32 %s171_s10, 5  ;;  %s1031_s19 = sshll.u32 %s1271_s16, 5 }
  0x1b   : > { %s1399_s18 = scalar_select %p39_p9, %s1263_s14, %s41_s6  }
  0x1c   : > { %s183_s26 = scalar_lea.hbm %s1538_s0, %s1031_s19  ;;  %s175_s28 = scalar_lea.vmem [#allocation3], %s967_s11 }
  0x1d   : > { %s186_s29 = sshll.u32 %s175_s28, 4  ;;  %s184_s21 = sshll.u32 %s183_s26, 4  ;;  %s187_s29 = int_to_ptr.vmem [resolvable:$true] %s186_s29  ;;  %s185_s21 = int_to_ptr.hbm [resolvable:$true] %s184_s21 }
  0x1e   : > { %p1054_p2 = pnand %p1062_p7, %p1384_p3  ;;  %s172_s30 = scalar_lea.sflag [#allocation4], %s171_s10 }
  0x1f   : > { %s1280_s4 = smov 256   ;;  %s1281_s1 = smov 16  }
  0x20   : > { %1056 = dma.hbm_to_vmem [thread:$0]  (!%p1054_p2), %s185_s21, 512, %s187_s29, %s172_s30, %s1280_s4, %s1280_s4, %s1281_s1  }
  0x21   : > { %198 = sbr.rel (%p1368_p8) target bundleno = 395 (0x18b), region = 32  ;;  %s1410_s6 = sand.u32 (!%p1368_p8), 1, %s1259_s13  }
  0x22   : > { %s971_s9 = sshll.u32 (!%p1368_p8), %s1410_s6, 5  ;;  %s201_s11 = scalar_lea.sflag (!%p1368_p8), [#allocation4], %s1410_s6 }
  0x23   : > { %s1414_s19 = scalar_lea.vmem (!%p1368_p8), [#allocation3], %s971_s9 }
  0x26   : > { %1242 = dma.done.wait (%p1355_p4), %s201_s11, 512  }
  0x27   : > { %1244 = vsyncadd (%p1355_p4), %s201_s11, 4294966784 }
  0x28   : > { %1246 = dma.done.wait (%p1345_p1), [#allocation7], 576  }
  0x29   : > { %1248 = vsyncadd (%p1345_p1), [#allocation7], 4294966720  ;;  %v990_v0 = vld [vmem:[%s1414_s19] sm:$0xf]  ;;  %v1037_v1 = vld [vmem:[%s1414_s19 + $0xc] sm:$0xf0] }
  0x2a   : > { %v1426_v2 = vor.u32 %v1037_v1, %v990_v0  ;;  %v998_v3 = vld [vmem:[%s1414_s19 + $0x8] sm:$0xf]  ;;  %v1038_v4 = vld [vmem:[%s1414_s19 + $0x14] sm:$0xf0]  ;;  %s1282_s1 = smov 124   ;;  %s1283_s20 = smov 126  }
  0x2b   : > { %v999_v5 = vor.u32 %v1038_v4, %v998_v3  ;;  %v1035_v6 = vld [vmem:[%s1414_s19 + $0x4] sm:$0xf]  ;;  %v992_v7 = vld [vmem:[%s1414_s19 + $0x10] sm:$0xf0]  ;;  %v1036_v8 = vld [vmem:[%s1414_s19 + $0xc] sm:$0xf] }
  0x2c   : > { %396 = vrot.lane.b32.xlu1 %v1426_v2, %s1282_s1  ;;  %334 = vrot.lane.b32.xlu0 %v1426_v2, %s1283_s20  ;;  %v1000_v9 = vld [vmem:[%s1414_s19 + $0x18] sm:$0xf0]  ;;  %v995_v10 = vor.u32 %v1035_v6, %v992_v7  ;;  %s1284_s22 = smov 88   ;;  %s1285_s27 = smov 86   ;;  %v975_v12 = vld [vmem:[%s1414_s19] sm:$0xf] }
  0x2d   : > { %338 = vrot.lane.b32.xlu2 %v999_v5, %s1283_s20  ;;  %v1003_v11 = vor.u32 %v1036_v8, %v1000_v9  ;;  %s1286_s7 = smov 84   ;;  %s1287_s10 = smov 48   ;;  %v1033_v13 = vld [vmem:[%s1414_s19 + $0xc] sm:$0xf0]  ;;  %v1032_v15 = vld [vmem:[%s1414_s19 + $0x4] sm:$0xf] }
  0x2e   : > { %v976_v14 = vor.u32 %v1033_v13, %v975_v12  ;;  %v977_v16 = vld [vmem:[%s1414_s19 + $0x10] sm:$0xf0]  ;;  %v983_v17 = vld [vmem:[%s1414_s19 + $0x8] sm:$0xf]  ;;  %v1034_v19 = vld [vmem:[%s1414_s19 + $0x14] sm:$0xf0] }
  0x2f   : > { %v980_v18 = vor.u32 %v1032_v15, %v977_v16  ;;  %v984_v20 = vor.u32 %v1034_v19, %v983_v17  ;;  %v249_v21 = vld [vmem:[#allocation6] sm:$0xf]  ;;  %vm266_vm0 = vcmask 130048   ;;  %s1288_s24 = smov 46   ;;  %s1289_s25 = smov 44   ;;  %vm342_vm1 = vcmask 1031168  }
  0x30   : > { %277 = vmatpush.bf16.msra.mxu0 %v976_v14  ;;  %v317_v25 = vld [vmem:[#allocation6 + $0x4] sm:$0xf]  ;;  %vm404_vm2 = vcmask 1014784   ;;  %v395_v35 = vld [vmem:[#allocation6 + $0x8] sm:$0xf]  ;;  %vm466_vm3 = vcmask 719872  }
  0x31   : > { %290 = vmatpush.bf16.msra.mxu1 %v980_v18  ;;  %303 = vmatpush.bf16.msra.mxu2 %v984_v20  ;;  %v457_v47 = vld [vmem:[#allocation6 + $0xc] sm:$0xf]  ;;  %vm528_vm4 = vcmask 703488   ;;  %vm590_vm5 = vcmask 687104   ;;  %v519_v58 = vld [vmem:[#allocation6 + $0x10] sm:$0xf] }
  0x32   : > { %vm652_vm6 = vcmask 392192   ;;  %vm714_vm7 = vcmask 375808   ;;  %v643_v6 = vld [vmem:[#allocation6 + $0x18] sm:$0xf]  ;;  %v837_v7 = vld [vmem:[%s1540_s2] sm:$0xff]  ;;  %v1290_v8 = vmov 0  }
  0x33   : > { %985 = vmatmul.msk.bf16.vlgmr.msra.gmra.mxu0 %vm266_vm0, %v249_v21  ;;  %1127 = vset.pattern.permute.xlu2 %v1290_v8  ;;  %vm776_vm8 = vcmask 359424   ;;  %s1039_s29 = smul.u32 24, %s1410_s6 }
  0x34   : > { %398 = vrot.lane.b32.xlu1 %v995_v10, %s1282_s1  ;;  %336 = vrot.lane.b32.xlu0 %v995_v10, %s1283_s20  ;;  %s1040_s21 = smul.u32 24, %s1267_s15 }
  0x35   : > { %340 = vrot.lane.b32.xlu2 %v1003_v11, %s1283_s20  ;;  %986 = vmatmul.msk.bf16.vlgmr.msra.gmra.mxu1 %vm266_vm0, %v249_v21  ;;  %s232_s30 = scalar_lea.vmem [#allocation8], %s1039_s29 }
  0x36   : > { %987 = vmatmul.msk.bf16.vlgmr.msra.gmra.mxu2 %vm266_vm0, %v249_v21  ;;  %1128 = vset.pattern.permute.xlu0 %v1290_v8  ;;  %s864_s11 = scalar_lea.hbm %s1541_s3, %s1040_s21  ;;  %s866_s15 = sshll.u32 %s232_s30, 4  ;;  %s867_s15 = int_to_ptr.vmem [resolvable:$true] %s866_s15 }
  0x37   : > { %s868_s19 = sshll.u32 %s864_s11, 4  ;;  %s869_s19 = int_to_ptr.hbm [resolvable:$true] %s868_s19 }
  0x38   : > { %s1203_s20 = sshra.s32 %s869_s19, 4  ;;  %s1204_s20 = int_to_ptr.hbm [resolvable:$true] %s1203_s20 }
  0x39   : > { %p1210_p10 = scmp.lt.s32.totalorder %s1204_s20, %s1541_s3 }
  0x3c   : > { %460 = vrot.lane.b32.xlu1 %v995_v10, %s1284_s22  ;;  %400 = vrot.lane.b32.xlu0 %v999_v5, %s1282_s1 }
  0x3d   : > { %462 = vrot.lane.b32.xlu2 %v999_v5, %s1284_s22 }
  0x44   : > { %458 = vrot.lane.b32.xlu1 %v1426_v2, %s1284_s22  ;;  %402 = vrot.lane.b32.xlu0 %v1003_v11, %s1282_s1  ;;  %s853_s1 = scalar_lea.sflag [#allocation5], %s1410_s6 }
  0x45   : > { %464 = vrot.lane.b32.xlu2 %v1003_v11, %s1284_s22  ;;  %s1205_s22 = scalar_lea.hbm %s1204_s20, 24 }
  0x46   : > { %p1206_p1 = scmp.ne.s32.totalorder %s1204_s20, %s1205_s22 }
  0x48   : > { %p1207_p4 = pnand %p1206_p1, %p1390_p5 }
  0x4a   : > { %p1208_p8 = pneg %p1207_p4 }
  0x4c   : > { %526 = vrot.lane.b32.xlu1 %v1003_v11, %s1285_s27  ;;  %524 = vrot.lane.b32.xlu0 %v999_v5, %s1285_s27 }
  0x4d   : > { %520 = vrot.lane.b32.xlu2 %v1426_v2, %s1285_s27 }
  0x54   : > { %582 = vrot.lane.b32.xlu1 %v1426_v2, %s1286_s7  ;;  %522 = vrot.lane.b32.xlu0 %v995_v10, %s1285_s27 }
  0x55   : > { %584 = vrot.lane.b32.xlu2 %v995_v10, %s1286_s7 }
  0x5c   : > { %646 = vrot.lane.b32.xlu1 %v995_v10, %s1287_s10  ;;  %644 = vrot.lane.b32.xlu0 %v1426_v2, %s1287_s10 }
  0x5d   : > { %586 = vrot.lane.b32.xlu2 %v999_v5, %s1286_s7 }
  0x64   : > { %648 = vrot.lane.b32.xlu1 %v999_v5, %s1287_s10  ;;  %588 = vrot.lane.b32.xlu0 %v1003_v11, %s1286_s7 }
  0x65   : > { %708 = vrot.lane.b32.xlu2 %v995_v10, %s1288_s24 }
  0x6c   : > { %710 = vrot.lane.b32.xlu0 %v999_v5, %s1288_s24  ;;  %650 = vrot.lane.b32.xlu1 %v1003_v11, %s1287_s10  ;;  %s1209_s10 = scalar_lea.hbm %s1541_s3, 48 }
  0x6d   : > { %706 = vrot.lane.b32.xlu2 %v1426_v2, %s1288_s24  ;;  %p1211_p12 = scmp.lt.s32.totalorder %s1209_s10, %s1205_s22 }
  0x6f   : > { %p1212_p13 = por %p1211_p12, %p1210_p10 }
  0x71   : > { %p1213_p0 = pnand %p1212_p13, %p1208_p8 }
  0x74   : > { %712 = vrot.lane.b32.xlu0 %v1003_v11, %s1288_s24  ;;  %772 = vrot.lane.b32.xlu1 %v999_v5, %s1289_s25  ;;  %v581_v5 = vld [vmem:[#allocation6 + $0x14] sm:$0xf] }
  0x75   : > { %774 = vrot.lane.b32.xlu2 %v1003_v11, %s1289_s25 }
  0x7c   : > { %770 = vrot.lane.b32.xlu1 %v995_v10, %s1289_s25  ;;  %768 = vrot.lane.b32.xlu0 %v1426_v2, %s1289_s25 }
  0x7d   : > { %840 = vperm.xlu2 %1127, %v837_v7  }
  0x87   : > { %v339_v22 = vpop.permute.xlu2 %338 }
  0x8f   : > { %v341_v23 = vpop.permute.xlu2 %340 }
  0x90   : > { %v345_v24 = vsel %vm342_vm1, %v339_v22, %v341_v23  ;;  %v705_v23 = vld [vmem:[#allocation6 + $0x1c] sm:$0xf] }
  0x91   : > { %385 = vmatpush.bf16.msrb.mxu1 %v345_v24 }
  0x94   : > { %1006 = vmatmul.msk.bf16.vlgmr.msrb.gmra.mxu1 %vm266_vm0, %v317_v25 }
  0x97   : > { %v463_v26 = vpop.permute.xlu2 %462 }
  0x9e   : > { %v397_v27 = vpop.permute.xlu1 %396  ;;  %v335_v28 = vpop.permute.xlu0 %334 }
  0x9f   : > { %v465_v29 = vpop.permute.xlu2 %464 }
  0xa0   : > { %v469_v39 = vsel %vm466_vm3, %v463_v26, %v465_v29  ;;  %v767_v29 = vld [vmem:[#allocation6 + $0x20] sm:$0xf] }
  0xa6   : > { %v399_v30 = vpop.permute.xlu1 %398  ;;  %v337_v31 = vpop.permute.xlu0 %336 }
  0xa7   : > { %v343_v32 = vsel %vm342_vm1, %v335_v28, %v337_v31  ;;  %v344_v33 = vsel %vm342_vm1, %v337_v31, %v339_v22  ;;  %v405_v34 = vsel %vm404_vm2, %v397_v27, %v399_v30  ;;  %v521_v36 = vpop.permute.xlu2 %520 }
  0xa8   : > { %359 = vmatpush.bf16.msra.mxu3 %v343_v32  ;;  %372 = vmatpush.bf16.msrb.mxu0 %v344_v33 }
  0xa9   : > { %421 = vmatpush.bf16.msrb.mxu2 %v405_v34 }
  0xab   : > { %1004 = vmatmul.msk.bf16.vlgmr.msra.gmra.mxu3 %vm266_vm0, %v317_v25  ;;  %1005 = vmatmul.msk.bf16.vlgmr.msrb.gmra.mxu0 %vm266_vm0, %v317_v25 }
  0xac   : > { %1007 = vmatmul.msk.bf16.vlgmr.msrb.gmra.mxu2 %vm266_vm0, %v395_v35 }
  0xae   : > { %v461_v37 = vpop.permute.xlu1 %460  ;;  %v401_v38 = vpop.permute.xlu0 %400 }
  0xaf   : > { %v468_v40 = vsel %vm466_vm3, %v461_v37, %v463_v26  ;;  %v406_v41 = vsel %vm404_vm2, %v399_v30, %v401_v38  ;;  %v585_v42 = vpop.permute.xlu2 %584 }
  0xb0   : > { %434 = vmatpush.bf16.msrb.mxu3 %v406_v41  ;;  %496 = vmatpush.bf16.msra.mxu2 %v468_v40  ;;  %v1481_v13 = vpop.f32.mrf.mxu0 }
  0xb2   : > { %v1483_v14 = vpop.f32.mrf.mxu1 }
  0xb4   : > { %509 = vmatpush.bf16.msra.mxu3 %v469_v39 }
  0xb6   : > { %v459_v43 = vpop.permute.xlu1 %458  ;;  %v403_v44 = vpop.permute.xlu0 %402 }
  0xb7   : > { %v467_v45 = vsel %vm466_vm3, %v459_v43, %v461_v37  ;;  %v407_v46 = vsel %vm404_vm2, %v401_v38, %v403_v44  ;;  %v587_v51 = vpop.permute.xlu2 %586 }
  0xb8   : > { %447 = vmatpush.bf16.msra.mxu0 %v407_v46  ;;  %483 = vmatpush.bf16.msra.mxu1 %v467_v45  ;;  %v592_v54 = vsel %vm590_vm5, %v585_v42, %v587_v51  ;;  %v281_v20 = vpop.f32.mrf.mxu0 }
  0xb9   : > { %v305_v22 = vpop.f32.mrf.mxu2 }
  0xba   : > { %v294_v21 = vpop.f32.mrf.mxu1 }
  0xbb   : > { %1008 = vmatmul.msk.bf16.vlgmr.msrb.gmra.mxu3 %vm266_vm0, %v395_v35  ;;  %1009 = vmatmul.msk.bf16.vlgmr.msra.gmra.mxu0 %vm266_vm0, %v395_v35 }
  0xbc   : > { %1010 = vmatmul.msk.bf16.vlgmr.msra.gmra.mxu1 %vm266_vm0, %v457_v47  ;;  %1011 = vmatmul.msk.bf16.vlgmr.msra.gmra.mxu2 %vm266_vm0, %v457_v47 }
  0xbe   : > { %v527_v48 = vpop.permute.xlu1 %526  ;;  %v525_v49 = vpop.permute.xlu0 %524 }
  0xbf   : > { %v531_v50 = vsel %vm528_vm4, %v525_v49, %v527_v48  ;;  %v709_v59 = vpop.permute.xlu2 %708 }
  0xc0   : > { %571 = vmatpush.bf16.msrb.mxu2 %v531_v50 }
  0xc1   : > { %v307_v28 = vpop.f32.mrf.mxu2 }
  0xc6   : > { %v583_v52 = vpop.permute.xlu1 %582  ;;  %v523_v53 = vpop.permute.xlu0 %522 }
  0xc7   : > { %v529_v55 = vsel %vm528_vm4, %v521_v36, %v523_v53  ;;  %v530_v56 = vsel %vm528_vm4, %v523_v53, %v525_v49  ;;  %v591_v57 = vsel %vm590_vm5, %v583_v52, %v585_v42  ;;  %v707_v63 = vpop.permute.xlu2 %706 }
  0xc8   : > { %545 = vmatpush.bf16.msrb.mxu0 %v529_v55  ;;  %558 = vmatpush.bf16.msrb.mxu1 %v530_v56  ;;  %v715_v2 = vsel %vm714_vm7, %v707_v63, %v709_v59 }
  0xc9   : > { %607 = vmatpush.bf16.msrb.mxu3 %v591_v57 }
  0xcb   : > { %1012 = vmatmul.msk.bf16.vlgmr.msra.gmra.mxu3 %vm266_vm0, %v457_v47  ;;  %1013 = vmatmul.msk.bf16.vlgmr.msrb.gmra.mxu0 %vm266_vm0, %v519_v58 }
  0xcc   : > { %620 = vmatpush.bf16.msra.mxu0 %v592_v54  ;;  %1014 = vmatmul.msk.bf16.vlgmr.msrb.gmra.mxu1 %vm266_vm0, %v519_v58 }
  0xcd   : > { %1015 = vmatmul.msk.bf16.vlgmr.msrb.gmra.mxu2 %vm266_vm0, %v519_v58 }
  0xce   : > { %v647_v60 = vpop.permute.xlu1 %646  ;;  %v645_v61 = vpop.permute.xlu0 %644 }
  0xcf   : > { %v653_v62 = vsel %vm652_vm6, %v645_v61, %v647_v60  ;;  %v775_v15 = vpop.permute.xlu2 %774 }
  0xd0   : > { %669 = vmatpush.bf16.msra.mxu2 %v653_v62 }
  0xd6   : > { %v649_v0 = vpop.permute.xlu1 %648  ;;  %v589_v1 = vpop.permute.xlu0 %588 }
  0xd7   : > { %v654_v3 = vsel %vm652_vm6, %v647_v60, %v649_v0  ;;  %v593_v4 = vsel %vm590_vm5, %v587_v51, %v589_v1 }
  0xd8   : > { %633 = vmatpush.bf16.msra.mxu1 %v593_v4  ;;  %682 = vmatpush.bf16.msra.mxu3 %v654_v3 }
  0xdb   : > { %1016 = vmatmul.msk.bf16.vlgmr.msrb.gmra.mxu3 %vm266_vm0, %v581_v5  ;;  %1017 = vmatmul.msk.bf16.vlgmr.msra.gmra.mxu0 %vm266_vm0, %v581_v5 }
  0xdc   : > { %731 = vmatpush.bf16.msrb.mxu1 %v715_v2 }
  0xdd   : > { %1018 = vmatmul.msk.bf16.vlgmr.msra.gmra.mxu1 %vm266_vm0, %v581_v5  ;;  %1019 = vmatmul.msk.bf16.vlgmr.msra.gmra.mxu2 %vm266_vm0, %v643_v6 }
  0xde   : > { %v711_v9 = vpop.permute.xlu0 %710  ;;  %v651_v10 = vpop.permute.xlu1 %650 }
  0xdf   : > { %v716_v11 = vsel %vm714_vm7, %v709_v59, %v711_v9  ;;  %v655_v12 = vsel %vm652_vm6, %v649_v0, %v651_v10 }
  0xe0   : > { %695 = vmatpush.bf16.msrb.mxu0 %v655_v12  ;;  %744 = vmatpush.bf16.msrb.mxu2 %v716_v11 }
  0xe6   : > { %v713_v16 = vpop.permute.xlu0 %712  ;;  %v773_v17 = vpop.permute.xlu1 %772 }
  0xe7   : > { %v717_v18 = vsel %vm714_vm7, %v711_v9, %v713_v16  ;;  %v779_v19 = vsel %vm776_vm8, %v773_v17, %v775_v15 }
  0xe8   : > { %757 = vmatpush.bf16.msrb.mxu3 %v717_v18  ;;  %819 = vmatpush.bf16.msra.mxu2 %v779_v19 }
  0xeb   : > { %1020 = vmatmul.msk.bf16.vlgmr.msra.gmra.mxu3 %vm266_vm0, %v643_v6  ;;  %1021 = vmatmul.msk.bf16.vlgmr.msrb.gmra.mxu0 %vm266_vm0, %v643_v6 }
  0xed   : > { %1022 = vmatmul.msk.bf16.vlgmr.msrb.gmra.mxu1 %vm266_vm0, %v705_v23  ;;  %1023 = vmatmul.msk.bf16.vlgmr.msrb.gmra.mxu2 %vm266_vm0, %v705_v23 }
  0xee   : > { %v771_v24 = vpop.permute.xlu1 %770  ;;  %v769_v25 = vpop.permute.xlu0 %768 }
  0xef   : > { %v778_v26 = vsel %vm776_vm8, %v771_v24, %v773_v17  ;;  %v777_v27 = vsel %vm776_vm8, %v769_v25, %v771_v24  ;;  %v841_v24 = vpop.permute.xlu2 %840 }
  0xf0   : > { %806 = vmatpush.bf16.msra.mxu1 %v778_v26  ;;  %793 = vmatpush.bf16.msra.mxu0 %v777_v27 }
  0xfb   : > { %1024 = vmatmul.msk.bf16.vlgmr.msrb.gmra.mxu3 %vm266_vm0, %v705_v23  ;;  %1025 = vmatmul.msk.bf16.vlgmr.msra.gmra.mxu0 %vm266_vm0, %v767_v29 }
  0xfd   : > { %1026 = vmatmul.msk.bf16.vlgmr.msra.gmra.mxu1 %vm266_vm0, %v767_v29  ;;  %1027 = vmatmul.msk.bf16.vlgmr.msra.gmra.mxu2 %vm266_vm0, %v767_v29 }
 0x111   : > { %v387_v30 = vpop.f32.mrf.mxu1 }
 0x112   : > { %v393_v31 = vadd.f32 %v387_v30, %v305_v22 }
 0x119   : > { %v389_v32 = vpop.f32.mrf.mxu1 }
 0x128   : > { %v374_v33 = vpop.f32.mrf.mxu0 }
 0x129   : > { %v392_v0 = vadd.f32 %v374_v33, %v1483_v14 }
 0x12e   : > { %v361_v34 = vpop.f32.mrf.mxu3 }
 0x12f   : > { %v423_v35 = vpop.f32.mrf.mxu2  ;;  %v391_v62 = vadd.f32 %v361_v34, %v1481_v13 }
 0x130   : > { %v376_v36 = vpop.f32.mrf.mxu0 }
 0x131   : > { %v453_v4 = vadd.f32 %v423_v35, %v391_v62 }
 0x136   : > { %v363_v37 = vpop.f32.mrf.mxu3 }
 0x137   : > { %v425_v38 = vpop.f32.mrf.mxu2 }
 0x138   : > { %v449_v39 = vpop.f32.mrf.mxu0 }
 0x139   : > { %v485_v40 = vpop.f32.mrf.mxu1  ;;  %v455_v17 = vadd.f32 %v449_v39, %v393_v31 }
 0x13a   : > { %v515_v5 = vadd.f32 %v485_v40, %v453_v4 }
 0x13e   : > { %v436_v41 = vpop.f32.mrf.mxu3 }
 0x13f   : > { %v498_v42 = vpop.f32.mrf.mxu2  ;;  %v454_v3 = vadd.f32 %v436_v41, %v392_v0 }
 0x140   : > { %v451_v43 = vpop.f32.mrf.mxu0 }
 0x141   : > { %v487_v44 = vpop.f32.mrf.mxu1  ;;  %v516_v6 = vadd.f32 %v498_v42, %v454_v3 }
 0x146   : > { %v438_v45 = vpop.f32.mrf.mxu3 }
 0x147   : > { %v500_v46 = vpop.f32.mrf.mxu2 }
 0x148   : > { %v547_v47 = vpop.f32.mrf.mxu0 }
 0x149   : > { %v560_v48 = vpop.f32.mrf.mxu1  ;;  %v577_v8 = vadd.f32 %v547_v47, %v515_v5 }
 0x14a   : > { %v578_v10 = vadd.f32 %v560_v48, %v516_v6 }
 0x14e   : > { %v511_v49 = vpop.f32.mrf.mxu3 }
 0x14f   : > { %v517_v18 = vadd.f32 %v511_v49, %v455_v17 }
 0x150   : > { %v573_v50 = vpop.f32.mrf.mxu2  ;;  %v549_v51 = vpop.f32.mrf.mxu0 }
 0x151   : > { %v562_v52 = vpop.f32.mrf.mxu1  ;;  %v579_v25 = vadd.f32 %v573_v50, %v517_v18 }
 0x156   : > { %v513_v53 = vpop.f32.mrf.mxu3 }
 0x158   : > { %v575_v54 = vpop.f32.mrf.mxu2  ;;  %v622_v55 = vpop.f32.mrf.mxu0 }
 0x159   : > { %v640_v16 = vadd.f32 %v622_v55, %v578_v10 }
 0x15a   : > { %v635_v56 = vpop.f32.mrf.mxu1 }
 0x15b   : > { %v641_v29 = vadd.f32 %v635_v56, %v579_v25 }
 0x15e   : > { %v609_v57 = vpop.f32.mrf.mxu3 }
 0x15f   : > { %v639_v12 = vadd.f32 %v609_v57, %v577_v8 }
 0x160   : > { %v671_v58 = vpop.f32.mrf.mxu2  ;;  %v624_v59 = vpop.f32.mrf.mxu0 }
 0x161   : > { %v701_v14 = vadd.f32 %v671_v58, %v639_v12 }
 0x162   : > { %v637_v60 = vpop.f32.mrf.mxu1 }
 0x166   : > { %v611_v61 = vpop.f32.mrf.mxu3 }
 0x168   : > { %v673_v63 = vpop.f32.mrf.mxu2  ;;  %v697_v1 = vpop.f32.mrf.mxu0 }
 0x169   : > { %v703_v31 = vadd.f32 %v697_v1, %v641_v29 }
 0x16a   : > { %v733_v2 = vpop.f32.mrf.mxu1 }
 0x16b   : > { %v763_v20 = vadd.f32 %v733_v2, %v701_v14 }
 0x16e   : > { %v684_v7 = vpop.f32.mrf.mxu3 }
 0x16f   : > { %v702_v13 = vadd.f32 %v684_v7, %v640_v16 }
 0x170   : > { %v746_v9 = vpop.f32.mrf.mxu2  ;;  %v699_v11 = vpop.f32.mrf.mxu0 }
 0x171   : > { %v764_v22 = vadd.f32 %v746_v9, %v702_v13 }
 0x172   : > { %v735_v15 = vpop.f32.mrf.mxu1 }
 0x176   : > { %v686_v19 = vpop.f32.mrf.mxu3 }
 0x178   : > { %v748_v21 = vpop.f32.mrf.mxu2  ;;  %v795_v23 = vpop.f32.mrf.mxu0 }
 0x179   : > { %v825_v26 = vadd.f32 %v795_v23, %v763_v20 }
 0x17a   : > { %v808_v27 = vpop.f32.mrf.mxu1 }
 0x17b   : > { %v826_v28 = vadd.f32 %v808_v27, %v764_v22  ;;  %v843_v30 = vadd.f32 %v841_v24, %v825_v26 }
 0x17d   : > { %v844_v32 = vadd.f32 %v841_v24, %v826_v28  ;;  %v846_v33 = vmax.f32 %v843_v30, 0.0 }
 0x17e   : > { %v759_v35 = vpop.f32.mrf.mxu3 }
 0x17f   : > { %v847_v34 = vmax.f32 %v844_v32, 0.0  ;;  %849 = vst [vmem:[%s232_s30] sm:$0xff] %v846_v33  ;;  %v765_v36 = vadd.f32 %v759_v35, %v703_v31 }
 0x180   : > { %v821_v37 = vpop.f32.mrf.mxu2  ;;  %v797_v38 = vpop.f32.mrf.mxu0 }
 0x181   : > { %850 = vst [vmem:[%s232_s30 + $0x8] sm:$0xff] %v847_v34  ;;  %v827_v39 = vadd.f32 %v821_v37, %v765_v36 }
 0x182   : > { %v810_v40 = vpop.f32.mrf.mxu1 }
 0x183   : > { %v845_v41 = vadd.f32 %v841_v24, %v827_v39 }
 0x185   : > { %v848_v42 = vmax.f32 %v845_v41, 0.0 }
 0x186   : > { %v761_v43 = vpop.f32.mrf.mxu3 }
 0x187   : > { %851 = vst [vmem:[%s232_s30 + $0x10] sm:$0xff] %v848_v42 }
 0x188   : > { %v823_v44 = vpop.f32.mrf.mxu2 }
 0x189   : > { %1216 = shalt.err (!%p1213_p0)
}
 0x18a   : > { %1047 = dma.vmem_to_hbm [thread:$0]  (%p1390_p5), %s867_s15, 384, %s869_s19, %s853_s1  }
 0x18b PF: > { %s880_s6 = sand.u32 1, %s1255_s12   ;;  %p1058_p3 = pnand %p966_p11, %p1360_p6 }
 0x18c   : > { %s881_s26 = scalar_lea.sflag [#allocation5], %s880_s6 }
 0x18d   : > { %p1059_p7 = pneg %p1058_p3 }
 0x18f   : > { %1250 = dma.done.wait (%p1059_p7), %s881_s26, 384  }
 0x190   : > { %1252 = vsyncadd (%p1059_p7), %s881_s26, 4294966912  ;;  %s20_s17 = sadd.s32 1, %s1275_s17   ;;  %s1551_s12 = smov %s1259_s13 }
 0x191   : > { %p17_p9 = scmp.ge.s32.totalorder %s20_s17, 4   ;;  %s1552_s13 = smov %s1263_s14 }
 0x192   : > { %s1553_s14 = smov %s1399_s18  ;;  %s1554_s15 = smov %s1271_s16 }
 0x193   : > { %s1555_s16 = smov %s1557_s5  ;;  %19 = sbr.rel (!%p17_p9) target bundleno = 9 (0x9), region = 98 }
 0x198   :  { %887 = vsyncpa [#allocation4], 1 }
 0x199   :  { %889 = vsyncpa [#allocation4 + $0x1], 1 }
 0x19a   :  { %890 = vsyncpa [#allocation7], 1 }
 0x19b   :  { %891 = vsyncpa [#allocation5], 1 }
 0x19c   :  { %893 = vsyncpa [#allocation5 + $0x1], 1 }

</bundles_post_ra>
